<compile_context>
chip_gen: v7x
topology: tpu7x:2x2x1
jax: 0.10.0
libtpu: 0.0.40
codegen_flags: <defaults>
</compile_context>

<pallas_src>
import jax
import jax.numpy as jnp
from jax.experimental import pallas as pl
from jax.experimental.pallas import tpu as pltpu


# ---------------------------------------------------------------------------
# Kernels
# ---------------------------------------------------------------------------

def _box_embed_kernel_xt(xt_ref, w_ref, b_ref, o_ref):
    # xt_ref: (4, TM)  transposed box inputs
    # w_ref : (4, H)   (transposed w.r.t. nn.Linear's (H, 4) weight)
    # b_ref : (1, H)
    # o_ref : (TM, H)
    y = jax.lax.dot_general(
        xt_ref[...],
        w_ref[...],
        dimension_numbers=(((0,), (0,)), ((), ())),  # contract dim 0 of both
        preferred_element_type=jnp.float32,
    )
    y = y + b_ref[...]
    o_ref[...] = jnp.maximum(y, 0.0).astype(o_ref.dtype)


def _box_embed_kernel_packed(xp_ref, w_ref, b_ref, o_ref):
    # xp_ref: (TM, 4k) row-major packed box inputs (k rows per packed row)
    # w_ref : (4k, k*H) block-diagonal weight (kron(I_k, W))
    # b_ref : (1, k*H)  tiled bias
    # o_ref : (TM, k*H) lane-dense output (k*H == 128)
    y = jnp.dot(xp_ref[...], w_ref[...], preferred_element_type=jnp.float32)
    y = y + b_ref[...]
    o_ref[...] = jnp.maximum(y, 0.0).astype(o_ref.dtype)


# ---------------------------------------------------------------------------
# Tiling helpers
# ---------------------------------------------------------------------------

def _vmem_capacity_bytes() -> int:
    """Physical VMEM of the current TPU generation (fallback: v7x's 64 MiB)."""
    try:
        info = pltpu.get_tpu_info()
        cap = getattr(info, "vmem_capacity_bytes", None)
        if cap:
            return int(cap)
    except Exception:
        pass
    return 64 * 1024 * 1024


def _pick_row_tile(n_rows: int, out_cols: int, in_cols_vmem: int):
    """Rows per grid step + VMEM capacity.

    Budget ~3/8 of physical VMEM for the double-buffered f32 input+output
    tiles (v5e/v6e: 48 MiB, v7x: 24 MiB), leaving headroom for weights,
    bias and compiler scratch.  TM is capped at 8192 and kept a multiple of
    512 so blocks satisfy the (8, 128) rule.
    """
    vmem_cap = _vmem_capacity_bytes()
    buf_budget = (3 * vmem_cap) // 8
    per_row = 2 * 4 * (out_cols + in_cols_vmem)      # 2 buffers * 4 B/elem
    tm = buf_budget // max(per_row, 1)
    tm = min(tm, 8192)
    tm = max((tm // 512) * 512, 512)
    if n_rows <= tm:
        # A single full-extent block would serialize all work onto one
        # TensorCore on v7x; split into >= 2 row tiles when worthwhile.
        if n_rows >= 1024:
            half = (((n_rows + 1) // 2) + 7) // 8 * 8
            return half, vmem_cap
        return n_rows, vmem_cap                       # full-dim block (legal)
    return tm, vmem_cap


# ---------------------------------------------------------------------------
# Public wrapper
# ---------------------------------------------------------------------------

def pie_feature_extractor(box_input, weight, bias, out_dtype=None):
    """box_input: (..., 4) float32; weight: (4, H); bias: (H,).

    Returns relu(box_input @ weight + bias) of shape (..., H).
    Set out_dtype=jnp.bfloat16 to halve the output writeback when the
    downstream consumer tolerates bf16 (changes numerics ~1e-3).
    """
    *lead, in_dim = box_input.shape
    assert in_dim == 4, "PIE box input must have last dim = 4"
    hidden = weight.shape[1]
    out_dtype = box_input.dtype if out_dtype is None else out_dtype

    n = 1
    for d in lead:
        n *= d
    x2d = box_input.reshape(n, 4)
    b2d = bias.reshape(1, hidden)

    # ---------------- lane-dense packed path (H < 128) ----------------
    if 0 < hidden < 128 and 128 % hidden == 0:
        k = 128 // hidden
        n_pad = ((n + k - 1) // k) * k
        if n_pad != n:
            x2d = jnp.pad(x2d, ((0, n_pad - n), (0, 0)))
        n_rows = n_pad // k
        xp = x2d.reshape(n_rows, 4 * k)                       # free reshape
        w_block = jnp.kron(jnp.eye(k, dtype=weight.dtype), weight)  # (4k, 128)
        b_block = jnp.tile(b2d, (1, k))                       # (1, 128)

        tm, vmem_cap = _pick_row_tile(n_rows, 128, 128)
        grid = (pl.cdiv(n_rows, tm),)
        cost = pl.CostEstimate(
            flops=2 * n_rows * (4 * k) * 128,
            transcendentals=0,
            bytes_accessed=4 * (n_rows * 4 * k + 4 * k * 128 + 128
                                + n_rows * 128),
        )

        out_p = pl.pallas_call(
            _box_embed_kernel_packed,
            out_shape=jax.ShapeDtypeStruct((n_rows, 128), out_dtype),
            grid_spec=pltpu.PrefetchScalarGridSpec(
                num_scalar_prefetch=0,
                grid=grid,
                in_specs=[
                    pl.BlockSpec((tm, 4 * k), lambda i: (i, 0)),   # packed acts
                    pl.BlockSpec((4 * k, 128), lambda i: (0, 0)),  # weight
                    pl.BlockSpec((1, 128), lambda i: (0, 0)),      # bias
                ],
                out_specs=pl.BlockSpec((tm, 128), lambda i: (i, 0)),
            ),
            compiler_params=pltpu.CompilerParams(
                dimension_semantics=("parallel",),
                vmem_limit_bytes=vmem_cap // 2,
            ),
            cost_estimate=cost,
        )(xp, w_block, b_block)

        out2d = out_p.reshape(n_pad, hidden)[:n]
        return out2d.reshape(*lead, hidden)

    # ---------------- general path (H >= 128, or H !| 128) ----------------
    # Transposed activations: (4, N).  One-time transpose; < 2% of total
    # traffic for H >= 256 (keep the whole wrapper inside one jit so XLA
    # schedules it next to the kernel).
    xt = x2d.T

    tm, vmem_cap = _pick_row_tile(n, hidden, 8)
    grid = (pl.cdiv(n, tm),)
    cost = pl.CostEstimate(
        flops=2 * n * 4 * hidden,
        transcendentals=0,
        bytes_accessed=4 * (n * 4 + 4 * hidden + hidden + n * hidden),
    )

    out2d = pl.pallas_call(
        _box_embed_kernel_xt,
        out_shape=jax.ShapeDtypeStruct((n, hidden), out_dtype),
        grid_spec=pltpu.PrefetchScalarGridSpec(
            num_scalar_prefetch=0,
            grid=grid,
            in_specs=[
                pl.BlockSpec((4, tm), lambda i: (0, i)),        # acts (transposed)
                pl.BlockSpec((4, hidden), lambda i: (0, 0)),    # weight (resident)
                pl.BlockSpec((1, hidden), lambda i: (0, 0)),    # bias (resident)
            ],
            out_specs=pl.BlockSpec((tm, hidden), lambda i: (i, 0)),
        ),
        compiler_params=pltpu.CompilerParams(
            dimension_semantics=("parallel",),
            vmem_limit_bytes=vmem_cap // 2,
        ),
        cost_estimate=cost,
    )(xt, weight, b2d)

    return out2d.reshape(*lead, hidden)


# ---------------------------------------------------------------------------
# Params / demo
# ---------------------------------------------------------------------------

def init_params(key, hidden_size):
    """Deterministic init mimicking nn.Linear default (uniform +-1/sqrt(fan_in))."""
    kw, kb = jax.random.split(key)
    bound = 1.0 / jnp.sqrt(4.0)
    # PyTorch stores weight as (H, 4); we keep the transposed (4, H) layout.
    weight = jax.random.uniform(kw, (4, hidden_size), jnp.float32, -bound, bound)
    bias = jax.random.uniform(kb, (hidden_size,), jnp.float32, -bound, bound)
    return weight, bias


if __name__ == "__main__":
    key = jax.random.PRNGKey(0)
    k_in, k_params, k_in2, k_params2 = jax.random.split(key, 4)

    fn = jax.jit(pie_feature_extractor)

    # --- small-H config (exercises the lane-dense packed path) ---
    batch, seq, hidden = 2, 8, 32
    box_input = jax.random.normal(k_in, (batch, seq, 4), jnp.float32)
    weight, bias = init_params(k_params, hidden)
    out = jax.block_until_ready(fn(box_input, weight, bias))
    ref = jnp.maximum(box_input @ weight + bias, 0.0)
    assert out.shape == (batch, seq, hidden)
    assert jnp.allclose(out, ref, atol=1e-5, rtol=1e-5)

    # --- H >= 128 config (exercises the transposed-feed path) ---
    batch2, seq2, hidden2 = 4, 8, 256
    box_input2 = jax.random.normal(k_in2, (batch2, seq2, 4), jnp.float32)
    weight2, bias2 = init_params(k_params2, hidden2)
    out2 = jax.block_until_ready(fn(box_input2, weight2, bias2))
    ref2 = jnp.maximum(box_input2 @ weight2 + bias2, 0.0)
    assert out2.shape == (batch2, seq2, hidden2)
    assert jnp.allclose(out2, ref2, atol=1e-5, rtol=1e-5)

    print("KERNEL_OK")
</pallas_src>

<mosaic_0001>
module attributes {stable_mosaic.version = 11 : i64} {
  func.func @_box_embed_kernel_packed(%arg0: i32, %arg1: memref<4x16xf32, #tpu.memory_space<vmem>>, %arg2: memref<16x128xf32, #tpu.memory_space<vmem>>, %arg3: memref<1x128xf32, #tpu.memory_space<vmem>>, %arg4: memref<4x128xf32, #tpu.memory_space<vmem>>) attributes {dimension_semantics = [#tpu.dimension_semantics<parallel>], iteration_bounds = array<i64: 1>, scalar_prefetch = 0 : i64, scratch_operands = 0 : i64, tpu.core_type = #tpu.core_type<tc>, window_params = [{transform_indices = @transform_0, window_bounds = array<i64: 4, 16>}, {pipeline_mode = #tpu.pipeline_mode<synchronous>, transform_indices = @transform_1, window_bounds = array<i64: 16, 128>}, {pipeline_mode = #tpu.pipeline_mode<synchronous>, transform_indices = @transform_2, window_bounds = array<i64: 1, 128>}, {transform_indices = @transform_3, window_bounds = array<i64: 4, 128>}]} {
    %c0 = arith.constant 0 : index
    %c0_0 = arith.constant 0 : index
    %0 = vector.load %arg1[%c0, %c0_0] : memref<4x16xf32, #tpu.memory_space<vmem>>, vector<4x16xf32>
    %c0_1 = arith.constant 0 : index
    %c0_2 = arith.constant 0 : index
    %1 = vector.load %arg2[%c0_1, %c0_2] : memref<16x128xf32, #tpu.memory_space<vmem>>, vector<16x128xf32>
    %cst = arith.constant dense<0.000000e+00> : vector<4x128xf32>
    %2 = tpu.matmul %0, %1, %cst {dimension_numbers = #tpu.dot_dimension_numbers<[1], [0], [0], [1], [0, 0, 1, 1], [], []>} : vector<4x16xf32>, vector<16x128xf32>, vector<4x128xf32> -> vector<4x128xf32>
    %c0_3 = arith.constant 0 : index
    %c0_4 = arith.constant 0 : index
    %3 = vector.load %arg3[%c0_3, %c0_4] : memref<1x128xf32, #tpu.memory_space<vmem>>, vector<1x128xf32>
    %4 = vector.broadcast %3 : vector<1x128xf32> to vector<4x128xf32>
    %5 = arith.addf %2, %4 : vector<4x128xf32>
    %cst_5 = arith.constant 0.000000e+00 : f32
    %6 = vector.broadcast %cst_5 : f32 to vector<4x128xf32>
    %7 = arith.maximumf %5, %6 : vector<4x128xf32>
    %c0_6 = arith.constant 0 : index
    %c0_7 = arith.constant 0 : index
    %8 = vector.load %arg4[%c0_6, %c0_7] : memref<4x128xf32, #tpu.memory_space<vmem>>, vector<4x128xf32>
    tpu.vector_store %arg4[%c0_6, %c0_7], %7 {strides = array<i32>} : memref<4x128xf32, #tpu.memory_space<vmem>>, vector<4x128xf32>,
    return
  }
  func.func @transform_0(%arg0: i32) -> (i32, i32) {
    %c0_i32 = arith.constant 0 : i32
    %c0_i32_0 = arith.constant 0 : i32
    return %arg0, %c0_i32 : i32, i32
  }
  func.func @transform_1(%arg0: i32) -> (i32, i32) {
    %c0_i32 = arith.constant 0 : i32
    %c0_i32_0 = arith.constant 0 : i32
    %c0_i32_1 = arith.constant 0 : i32
    return %c0_i32, %c0_i32_0 : i32, i32
  }
  func.func @transform_2(%arg0: i32) -> (i32, i32) {
    %c0_i32 = arith.constant 0 : i32
    %c0_i32_0 = arith.constant 0 : i32
    %c0_i32_1 = arith.constant 0 : i32
    return %c0_i32, %c0_i32_0 : i32, i32
  }
  func.func @transform_3(%arg0: i32) -> (i32, i32) {
    %c0_i32 = arith.constant 0 : i32
    %c0_i32_0 = arith.constant 0 : i32
    return %arg0, %c0_i32 : i32, i32
  }
}

</mosaic_0001>

<bundles_post_ra>
// kernel: pie_feature_extractor.1
= control target key start
LH: loop header
LB: loop body
LE: loop exit
PB: predicated region body
PF: predicated region fallthrough
CT: control target
= control target key end

     0   :  { %v122_v0 = vmov 0.0|0.0   ;;  %vm123_vm0 = vmmov 0   ;;  %v124_v3 = vmov 0.0   ;;  %vm24_vm1 = vcmask 130048   ;;  %s160_s1 = inlined_call_operand.vmem [shape: f32[16,128], index: 1, kind: input, shape index: {}]   ;;  %s161_s0 = inlined_call_operand.vmem [shape: f32[4,16], index: 0, kind: input, shape index: {}]   ;;  %s162_s2 = inlined_call_operand.vmem [shape: f32[1,128], index: 2, kind: input, shape index: {}]   ;;  %s163_s3 = inlined_call_operand.vmem [shape: f32[4,128], index: 3, kind: output, shape index: {}]  }
   0x1   :  { %116 = vmatprep.subr.bf16.mxu0 %v122_v0  ;;  %v15_v1 = vld [vmem:[%s160_s1] sm:$0xff]  ;;  %v16_v2 = vld [vmem:[%s160_s1 + $0x8] sm:$0xff]  ;;  %113 = vmatprep.mubr.msk.f32.mxu0 %vm123_vm0, %v124_v3 }
   0x2   :  { %v117_v4 = vpack.c.bf16 %v16_v2, %v15_v1  ;;  %v14_v5 = vld [vmem:[%s161_s0] sm:$0xf] }
   0x3   :  { %v104_v6 = vld [vmem:[%s162_s2] ss:$0 sm:$0xff] }
   0x4   :  { %118 = vmatpush3.bf16.msra.mxu0 %v117_v4 }
   0x7   :  { %114 = vmatmul.mubr.msk.f32.vlgmr.msra.gmra.mrb[0].mxu0 %vm24_vm1, %v14_v5 }
  0xda   :  { %v94_v7 = vpop.f32.mrb[0].mxu0 }
  0xdb   :  { %v95_v8 = vadd.f32 %v104_v6, %v94_v7  ;;  %v115_v9 = vpop.f32.mrb[1].mxu0 }
  0xdd   :  { %v98_v10 = vmax.f32 %v95_v8, 0.0 }
  0xdf   :  { %99 = vst [vmem:[%s163_s3] sm:$0xf] %v98_v10 }

</bundles_post_ra>
